<compile_context>
chip_gen: v7x
topology: tpu7x:2x2x1
jax: 0.10.0
libtpu: 0.0.40
codegen_flags: <defaults>
</compile_context>

<pallas_src>
import jax
import jax.numpy as jnp
from jax.experimental import pallas as pl
from jax.experimental.pallas import tpu as pltpu

MARGIN = 10.0          # OLTR DiscCentroidsLoss margin
REPEL_WEIGHT = 0.01    # OLTR DiscCentroidsLoss repel weight


def _ce_centroids_kernel(x_ref, feat_ref, target_ref, cent_t_ref, cent_sq_ref,
                         out_ref, acc_ce, acc_att, acc_rep):
    i = pl.program_id(1)   # inner (accumulation) axis; axis 0 is the core split

    @pl.when(i == 0)
    def _init():
        acc_ce[...] = jnp.zeros_like(acc_ce)
        acc_att[...] = jnp.zeros_like(acc_att)
        acc_rep[...] = jnp.zeros_like(acc_rep)

    x = x_ref[...].astype(jnp.float32)            # [TB, C] logits (f32 math)
    target = target_ref[...].astype(jnp.float32)  # [TB, C] soft labels
    feat = feat_ref[...].astype(jnp.float32)      # [TB, D]
    cent_t = cent_t_ref[...]                      # [D, C]  f32 (resident)
    cent_sq = cent_sq_ref[...]                    # [1, C]  f32 precomputed ||c_j||^2
    tb, c = x.shape

    # ---------------- CE with soft targets (f32) ----------------
    x_max = jnp.max(x, axis=-1, keepdims=True)
    xs = x - x_max
    lse = jnp.log(jnp.sum(jnp.exp(xs), axis=-1, keepdims=True))
    ce_elem = -target * (xs - lse)                                   # [TB, C]

    # ---------------- hard labels: first argmax(target) as boolean mask ----------------
    col = jax.lax.broadcasted_iota(jnp.int32, (tb, c), 1)
    t_max = jnp.max(target, axis=-1, keepdims=True)
    label = jnp.min(jnp.where(target == t_max, col, c), axis=-1, keepdims=True)  # [TB,1]
    mask = col == label                                              # [TB, C] bool

    # ---------------- pairwise squared distances (single f32 MXU matmul) ----------------
    feat_sq = jnp.sum(feat * feat, axis=-1, keepdims=True)           # [TB, 1]
    cross = jnp.dot(feat, cent_t, preferred_element_type=jnp.float32)  # [TB, C]
    distmat = jnp.maximum(feat_sq + cent_sq - 2.0 * cross, 0.0)      # clamp before sqrt
    hinge = jnp.maximum(MARGIN - jnp.sqrt(distmat), 0.0)

    # Lane-partial accumulation: only reduce over the batch (sublane) axis per
    # step; the cross-lane reduction happens once in _finalize.
    acc_ce[...] = acc_ce[...] + jnp.sum(ce_elem, axis=0, keepdims=True)
    acc_att[...] = acc_att[...] + jnp.sum(jnp.where(mask, distmat, 0.0),
                                          axis=0, keepdims=True)
    acc_rep[...] = acc_rep[...] + jnp.sum(jnp.where(mask, MARGIN, hinge),
                                          axis=0, keepdims=True)

    @pl.when(i == pl.num_programs(1) - 1)
    def _finalize():
        lane = jax.lax.broadcasted_iota(jnp.int32, (1, 8, 128), 2)
        ce_s = jnp.sum(acc_ce[...])
        at_s = jnp.sum(acc_att[...])
        rp_s = jnp.sum(acc_rep[...])
        out_ref[...] = jnp.where(lane == 0, ce_s,
                                 jnp.where(lane == 1, at_s,
                                           jnp.where(lane == 2, rp_s, 0.0)))


def _vmem_capacity_bytes():
    try:
        return int(pltpu.get_tpu_info().vmem_capacity_bytes)
    except Exception:
        return 64 << 20   # conservative fallback: v7x per-TensorCore VMEM


def _working_set_bytes(tb, c, d, stream_itemsize):
    """Per-core VMEM working set for a batch tile of `tb` rows."""
    stream = 2 * tb * (2 * c + d) * stream_itemsize    # double-buffered x/target/feat
    resident = 2 * (c * d * 4 + c * 4)                 # f32 [D,C] centroids + ||c||^2 (worst case 2 bufs)
    f32_tmp = 6 * tb * c * 4 + tb * d * 4              # softmax / distmat / mask intermediates
    acc = 3 * 8 * c * 4 + 8 * 128 * 4                  # lane-partial accumulators + output tile
    return stream + resident + f32_tmp + acc


def _pick_batch_tile(batch, c, d, stream_itemsize, capacity):
    """Largest batch tile (multiple of 8, dividing batch) fitting ~45% of VMEM."""
    budget = int(0.45 * capacity)
    for tb in (4096, 2048, 1024, 512, 256, 128, 64, 32, 16, 8):
        if tb <= batch and batch % tb == 0 and \
                _working_set_bytes(tb, c, d, stream_itemsize) <= budget:
            return tb
    # Nothing fits the budget (huge num_classes): smallest multiple-of-8 divisor.
    # TODO(synk): for very large num_classes, also tile the class axis with an
    # online-softmax CE and per-C-tile attract/repel partials.
    for tb in (8, 16, 32, 64, 128, 256, 512, 1024, 2048, 4096):
        if tb <= batch and batch % tb == 0:
            return tb
    return batch   # ragged batch: single full-batch tile (block == full dim)


def ce_centroids_loss2(x, feat, target, centroids, lambda_centr,
                       batch_tile=None, num_core_splits=2):
    """Returns (loss_ce + lambda*loss_centr, loss_ce, lambda*loss_centr)."""
    B, C = x.shape
    D = feat.shape[1]
    capacity = _vmem_capacity_bytes()
    stream_itemsize = max(jnp.dtype(x.dtype).itemsize,
                          jnp.dtype(feat.dtype).itemsize,
                          jnp.dtype(target.dtype).itemsize)
    tb = batch_tile if batch_tile is not None else _pick_batch_tile(
        B, C, D, stream_itemsize, capacity)
    assert B % tb == 0, "batch must be divisible by the batch tile"
    n_tiles = B // tb

    # Split batch tiles across TensorCores (v7x has 2; harmless on 1-TC parts).
    splits = max(1, int(num_core_splits))
    while splits > 1 and n_tiles % splits != 0:
        splits -= 1
    inner = n_tiles // splits

    # Hoisted, pre-transposed f32 centroids (one plain MXU matmul per tile, no
    # per-step transpose) and per-centroid squared norms.
    cent_f32 = centroids.astype(jnp.float32)
    cent_t = cent_f32.T                                          # [D, C]
    cent_sq = jnp.sum(cent_f32 * cent_f32, axis=-1)[None, :]     # [1, C]

    est = _working_set_bytes(tb, C, D, stream_itemsize)
    vmem_limit = min(int(0.9 * capacity), max(32 << 20, int(1.25 * est)))

    def _run(single_buffer_resident):
        resident_kw = (dict(pipeline_mode=pl.Buffered(1))
                       if single_buffer_resident else {})
        stream_map = lambda ci, ti: (ci * inner + ti, 0)
        const_map = lambda ci, ti: (0, 0)
        return pl.pallas_call(
            _ce_centroids_kernel,
            grid=(splits, inner),
            out_shape=jax.ShapeDtypeStruct((splits, 8, 128), jnp.float32),
            in_specs=[
                pl.BlockSpec((tb, C), stream_map),          # x logits
                pl.BlockSpec((tb, D), stream_map),          # feat
                pl.BlockSpec((tb, C), stream_map),          # target
                pl.BlockSpec((D, C), const_map, **resident_kw),   # centroids.T (resident)
                pl.BlockSpec((1, C), const_map, **resident_kw),   # ||c||^2     (resident)
            ],
            out_specs=pl.BlockSpec((1, 8, 128), lambda ci, ti: (ci, 0, 0)),
            scratch_shapes=[pltpu.VMEM((1, C), jnp.float32),
                            pltpu.VMEM((1, C), jnp.float32),
                            pltpu.VMEM((1, C), jnp.float32)],
            compiler_params=pltpu.CompilerParams(
                dimension_semantics=("parallel", "arbitrary"),
                vmem_limit_bytes=int(vmem_limit)),
        )(x, feat, target, cent_t, cent_sq)

    try:
        partials = _run(True)     # single-buffer the resident operands
    except Exception:
        partials = _run(False)    # fallback if pipeline_mode/Buffered(1) is rejected

    # Final 3-scalar combine + normalization in plain JAX (cheap).
    ce_sum = jnp.sum(partials[:, 0, 0])
    att_sum = jnp.sum(partials[:, 0, 1])
    rep_sum = jnp.sum(partials[:, 0, 2])
    loss_ce = ce_sum / B
    loss_attract = att_sum / (2.0 * B)
    loss_repel = rep_sum / (B * C)
    centr_scaled = lambda_centr * (loss_attract + REPEL_WEIGHT * loss_repel)
    return loss_ce + centr_scaled, loss_ce, centr_scaled


def _reference(x, feat, target, centroids, lambda_centr):
    """Pure-JAX reference mirroring the PyTorch forward (for verification)."""
    log_sm = jax.nn.log_softmax(x, axis=-1)
    loss_ce = jnp.mean(jnp.sum(-target * log_sm, axis=-1))
    label = jnp.argmax(target, axis=1)
    cent_b = centroids[label]
    b = feat.shape[0]
    loss_attract = jnp.sum((feat - cent_b) ** 2) / 2.0 / b
    distmat = (jnp.sum(feat ** 2, 1, keepdims=True)
               + jnp.sum(centroids ** 2, 1)[None, :]
               - 2.0 * feat @ centroids.T)
    mask = jax.nn.one_hot(label, centroids.shape[0]) > 0
    distmat_neg = jnp.where(mask, 0.0, distmat)
    loss_repel = jnp.mean(jnp.clip(MARGIN - jnp.sqrt(distmat_neg), 0.0, 1e6))
    loss_centr = loss_attract + REPEL_WEIGHT * loss_repel
    return (loss_ce + lambda_centr * loss_centr, loss_ce, lambda_centr * loss_centr)


if __name__ == "__main__":
    B, num_classes, feat_dim = 32, 8, 32
    lambda_centr = 0.1

    key = jax.random.PRNGKey(0)
    k1, k2, k3, k4 = jax.random.split(key, 4)
    x = jax.random.normal(k1, (B, num_classes), dtype=jnp.float32)
    feat = jax.random.normal(k2, (B, feat_dim), dtype=jnp.float32)
    labels = jax.random.randint(k3, (B,), 0, num_classes)
    target = jax.nn.one_hot(labels, num_classes, dtype=jnp.float32)
    # DiscCentroidsLoss.__init__: self.centroids = nn.Parameter(torch.randn(C, D))
    centroids = jax.random.normal(k4, (num_classes, feat_dim), dtype=jnp.float32)

    # batch_tile=8 -> 4 batch tiles -> 2 "parallel" core splits x 2 inner
    # accumulation steps, exercising both the per-core partial outputs and the
    # cross-tile accumulation path.
    total, ce, centr = ce_centroids_loss2(x, feat, target, centroids,
                                          lambda_centr, batch_tile=8)
    jax.block_until_ready((total, ce, centr))

    ref_total, ref_ce, ref_centr = _reference(x, feat, target, centroids, lambda_centr)
    assert jnp.allclose(total, ref_total, atol=1e-4, rtol=1e-4), (total, ref_total)
    assert jnp.allclose(ce, ref_ce, atol=1e-4, rtol=1e-4), (ce, ref_ce)
    assert jnp.allclose(centr, ref_centr, atol=1e-4, rtol=1e-4), (centr, ref_centr)

    print("KERNEL_OK")
</pallas_src>

<mosaic_0001>
module attributes {stable_mosaic.version = 11 : i64} {
  func.func @_ce_centroids_kernel(%arg0: i32, %arg1: i32, %arg2: memref<8x8xf32, #tpu.memory_space<vmem>>, %arg3: memref<8x32xf32, #tpu.memory_space<vmem>>, %arg4: memref<8x8xf32, #tpu.memory_space<vmem>>, %arg5: memref<32x8xf32, #tpu.memory_space<vmem>>, %arg6: memref<1x8xf32, #tpu.memory_space<vmem>>, %arg7: memref<1x8x128xf32, #tpu.memory_space<vmem>>, %arg8: memref<1x8xf32, #tpu.memory_space<vmem>>, %arg9: memref<1x8xf32, #tpu.memory_space<vmem>>, %arg10: memref<1x8xf32, #tpu.memory_space<vmem>>) attributes {dimension_semantics = [#tpu.dimension_semantics<parallel>, #tpu.dimension_semantics<arbitrary>], iteration_bounds = array<i64: 2, 2>, scalar_prefetch = 0 : i64, scratch_operands = 3 : i64, tpu.core_type = #tpu.core_type<tc>, window_params = [{transform_indices = @transform_0, window_bounds = array<i64: 8, 8>}, {transform_indices = @transform_1, window_bounds = array<i64: 8, 32>}, {transform_indices = @transform_2, window_bounds = array<i64: 8, 8>}, {pipeline_mode = #tpu.pipeline_mode<synchronous>, transform_indices = @transform_3, window_bounds = array<i64: 32, 8>}, {pipeline_mode = #tpu.pipeline_mode<synchronous>, transform_indices = @transform_4, window_bounds = array<i64: 1, 8>}, {transform_indices = @transform_5, window_bounds = array<i64: 1, 8, 128>}]} {
    %c0_i32 = arith.constant 0 : i32
    %0 = arith.cmpi eq, %arg1, %c0_i32 : i32
    %1 = arith.extui %0 : i1 to i32
    %c0_i32_0 = arith.constant 0 : i32
    %2 = arith.cmpi ne, %1, %c0_i32_0 : i32
    scf.if %2 {
      %cst_38 = arith.constant 0.000000e+00 : f32
      %71 = vector.broadcast %cst_38 : f32 to vector<1x8xf32>
      %c0_39 = arith.constant 0 : index
      %c0_40 = arith.constant 0 : index
      %72 = vector.load %arg8[%c0_39, %c0_40] : memref<1x8xf32, #tpu.memory_space<vmem>>, vector<1x8xf32>
      tpu.vector_store %arg8[%c0_39, %c0_40], %71 {strides = array<i32>} : memref<1x8xf32, #tpu.memory_space<vmem>>, vector<1x8xf32>,
      %cst_41 = arith.constant 0.000000e+00 : f32
      %73 = vector.broadcast %cst_41 : f32 to vector<1x8xf32>
      %c0_42 = arith.constant 0 : index
      %c0_43 = arith.constant 0 : index
      %74 = vector.load %arg9[%c0_42, %c0_43] : memref<1x8xf32, #tpu.memory_space<vmem>>, vector<1x8xf32>
      tpu.vector_store %arg9[%c0_42, %c0_43], %73 {strides = array<i32>} : memref<1x8xf32, #tpu.memory_space<vmem>>, vector<1x8xf32>,
      %cst_44 = arith.constant 0.000000e+00 : f32
      %75 = vector.broadcast %cst_44 : f32 to vector<1x8xf32>
      %c0_45 = arith.constant 0 : index
      %c0_46 = arith.constant 0 : index
      %76 = vector.load %arg10[%c0_45, %c0_46] : memref<1x8xf32, #tpu.memory_space<vmem>>, vector<1x8xf32>
      tpu.vector_store %arg10[%c0_45, %c0_46], %75 {strides = array<i32>} : memref<1x8xf32, #tpu.memory_space<vmem>>, vector<1x8xf32>,
    } else {
    }
    %c0 = arith.constant 0 : index
    %c0_1 = arith.constant 0 : index
    %3 = vector.load %arg2[%c0, %c0_1] : memref<8x8xf32, #tpu.memory_space<vmem>>, vector<8x8xf32>
    %c0_2 = arith.constant 0 : index
    %c0_3 = arith.constant 0 : index
    %4 = vector.load %arg4[%c0_2, %c0_3] : memref<8x8xf32, #tpu.memory_space<vmem>>, vector<8x8xf32>
    %c0_4 = arith.constant 0 : index
    %c0_5 = arith.constant 0 : index
    %5 = vector.load %arg3[%c0_4, %c0_5] : memref<8x32xf32, #tpu.memory_space<vmem>>, vector<8x32xf32>
    %c0_6 = arith.constant 0 : index
    %c0_7 = arith.constant 0 : index
    %6 = vector.load %arg5[%c0_6, %c0_7] : memref<32x8xf32, #tpu.memory_space<vmem>>, vector<32x8xf32>
    %c0_8 = arith.constant 0 : index
    %c0_9 = arith.constant 0 : index
    %7 = vector.load %arg6[%c0_8, %c0_9] : memref<1x8xf32, #tpu.memory_space<vmem>>, vector<1x8xf32>
    %cst = arith.constant dense<0xFF800000> : vector<8xf32>
    %8 = vector.multi_reduction <maximumf>, %3, %cst [1] : vector<8x8xf32> to vector<8xf32>
    %9 = vector.shape_cast %8 : vector<8xf32> to vector<8x1xf32>
    %10 = vector.broadcast %9 : vector<8x1xf32> to vector<8x8xf32>
    %11 = arith.subf %3, %10 : vector<8x8xf32>
    %12 = math.exp %11 : vector<8x8xf32>
    %cst_10 = arith.constant dense<0.000000e+00> : vector<8xf32>
    %13 = vector.multi_reduction <add>, %12, %cst_10 [1] : vector<8x8xf32> to vector<8xf32>
    %14 = vector.shape_cast %13 : vector<8xf32> to vector<8x1xf32>
    %15 = math.log %14 : vector<8x1xf32>
    %cst_11 = arith.constant 0.000000e+00 : f32
    %16 = vector.broadcast %cst_11 : f32 to vector<8x8xf32>
    %17 = arith.subf %16, %4 : vector<8x8xf32>
    %18 = vector.broadcast %15 : vector<8x1xf32> to vector<8x8xf32>
    %19 = arith.subf %11, %18 : vector<8x8xf32>
    %20 = arith.mulf %17, %19 : vector<8x8xf32>
    %21 = tpu.iota {dimensions = array<i32: 1>} : vector<8x8xi32>
    %cst_12 = arith.constant dense<0xFF800000> : vector<8xf32>
    %22 = vector.multi_reduction <maximumf>, %4, %cst_12 [1] : vector<8x8xf32> to vector<8xf32>
    %23 = vector.shape_cast %22 : vector<8xf32> to vector<8x1xf32>
    %24 = vector.broadcast %23 : vector<8x1xf32> to vector<8x8xf32>
    %25 = arith.cmpf oeq, %4, %24 : vector<8x8xf32>
    %c8_i32 = arith.constant 8 : i32
    %26 = vector.broadcast %c8_i32 : i32 to vector<8x8xi32>
    %27 = arith.select %25, %21, %26 : vector<8x8xi1>, vector<8x8xi32>
    %cst_13 = arith.constant dense<2147483647> : vector<8xi32>
    %28 = vector.multi_reduction <minsi>, %27, %cst_13 [1] : vector<8x8xi32> to vector<8xi32>
    %29 = vector.shape_cast %28 : vector<8xi32> to vector<8x1xi32>
    %30 = vector.broadcast %29 : vector<8x1xi32> to vector<8x8xi32>
    %31 = arith.cmpi eq, %21, %30 : vector<8x8xi32>
    %32 = arith.mulf %5, %5 : vector<8x32xf32>
    %cst_14 = arith.constant dense<0.000000e+00> : vector<8xf32>
    %33 = vector.multi_reduction <add>, %32, %cst_14 [1] : vector<8x32xf32> to vector<8xf32>
    %34 = vector.shape_cast %33 : vector<8xf32> to vector<8x1xf32>
    %cst_15 = arith.constant dense<0.000000e+00> : vector<8x8xf32>
    %35 = tpu.matmul %5, %6, %cst_15 {dimension_numbers = #tpu.dot_dimension_numbers<[1], [0], [0], [1], [0, 0, 1, 1], [], []>} : vector<8x32xf32>, vector<32x8xf32>, vector<8x8xf32> -> vector<8x8xf32>
    %36 = vector.broadcast %34 : vector<8x1xf32> to vector<8x8xf32>
    %37 = vector.broadcast %7 : vector<1x8xf32> to vector<8x8xf32>
    %38 = arith.addf %36, %37 : vector<8x8xf32>
    %cst_16 = arith.constant 2.000000e+00 : f32
    %39 = vector.broadcast %cst_16 : f32 to vector<8x8xf32>
    %40 = arith.mulf %39, %35 : vector<8x8xf32>
    %41 = arith.subf %38, %40 : vector<8x8xf32>
    %cst_17 = arith.constant 0.000000e+00 : f32
    %42 = vector.broadcast %cst_17 : f32 to vector<8x8xf32>
    %43 = arith.maximumf %41, %42 : vector<8x8xf32>
    %44 = math.sqrt %43 : vector<8x8xf32>
    %cst_18 = arith.constant 1.000000e+01 : f32
    %45 = vector.broadcast %cst_18 : f32 to vector<8x8xf32>
    %46 = arith.subf %45, %44 : vector<8x8xf32>
    %cst_19 = arith.constant 0.000000e+00 : f32
    %47 = vector.broadcast %cst_19 : f32 to vector<8x8xf32>
    %48 = arith.maximumf %46, %47 : vector<8x8xf32>
    %c0_20 = arith.constant 0 : index
    %c0_21 = arith.constant 0 : index
    %49 = vector.load %arg8[%c0_20, %c0_21] : memref<1x8xf32, #tpu.memory_space<vmem>>, vector<1x8xf32>
    %cst_22 = arith.constant dense<0.000000e+00> : vector<8xf32>
    %50 = vector.multi_reduction <add>, %20, %cst_22 [0] : vector<8x8xf32> to vector<8xf32>
    %51 = vector.shape_cast %50 : vector<8xf32> to vector<1x8xf32>
    %52 = arith.addf %49, %51 : vector<1x8xf32>
    %c0_23 = arith.constant 0 : index
    %c0_24 = arith.constant 0 : index
    %53 = vector.load %arg8[%c0_23, %c0_24] : memref<1x8xf32, #tpu.memory_space<vmem>>, vector<1x8xf32>
    tpu.vector_store %arg8[%c0_23, %c0_24], %52 {strides = array<i32>} : memref<1x8xf32, #tpu.memory_space<vmem>>, vector<1x8xf32>,
    %c0_25 = arith.constant 0 : index
    %c0_26 = arith.constant 0 : index
    %54 = vector.load %arg9[%c0_25, %c0_26] : memref<1x8xf32, #tpu.memory_space<vmem>>, vector<1x8xf32>
    %cst_27 = arith.constant 0.000000e+00 : f32
    %55 = vector.broadcast %cst_27 : f32 to vector<8x8xf32>
    %56 = arith.select %31, %43, %55 : vector<8x8xi1>, vector<8x8xf32>
    %cst_28 = arith.constant dense<0.000000e+00> : vector<8xf32>
    %57 = vector.multi_reduction <add>, %56, %cst_28 [0] : vector<8x8xf32> to vector<8xf32>
    %58 = vector.shape_cast %57 : vector<8xf32> to vector<1x8xf32>
    %59 = arith.addf %54, %58 : vector<1x8xf32>
    %c0_29 = arith.constant 0 : index
    %c0_30 = arith.constant 0 : index
    %60 = vector.load %arg9[%c0_29, %c0_30] : memref<1x8xf32, #tpu.memory_space<vmem>>, vector<1x8xf32>
    tpu.vector_store %arg9[%c0_29, %c0_30], %59 {strides = array<i32>} : memref<1x8xf32, #tpu.memory_space<vmem>>, vector<1x8xf32>,
    %c0_31 = arith.constant 0 : index
    %c0_32 = arith.constant 0 : index
    %61 = vector.load %arg10[%c0_31, %c0_32] : memref<1x8xf32, #tpu.memory_space<vmem>>, vector<1x8xf32>
    %cst_33 = arith.constant 1.000000e+01 : f32
    %62 = vector.broadcast %cst_33 : f32 to vector<8x8xf32>
    %63 = arith.select %31, %62, %48 : vector<8x8xi1>, vector<8x8xf32>
    %cst_34 = arith.constant dense<0.000000e+00> : vector<8xf32>
    %64 = vector.multi_reduction <add>, %63, %cst_34 [0] : vector<8x8xf32> to vector<8xf32>
    %65 = vector.shape_cast %64 : vector<8xf32> to vector<1x8xf32>
    %66 = arith.addf %61, %65 : vector<1x8xf32>
    %c0_35 = arith.constant 0 : index
    %c0_36 = arith.constant 0 : index
    %67 = vector.load %arg10[%c0_35, %c0_36] : memref<1x8xf32, #tpu.memory_space<vmem>>, vector<1x8xf32>
    tpu.vector_store %arg10[%c0_35, %c0_36], %66 {strides = array<i32>} : memref<1x8xf32, #tpu.memory_space<vmem>>, vector<1x8xf32>,
    %c1_i32 = arith.constant 1 : i32
    %68 = arith.cmpi eq, %arg1, %c1_i32 : i32
    %69 = arith.extui %68 : i1 to i32
    %c0_i32_37 = arith.constant 0 : i32
    %70 = arith.cmpi ne, %69, %c0_i32_37 : i32
    scf.if %70 {
      %71 = tpu.iota {dimensions = array<i32: 2>} : vector<1x8x128xi32>
      %c0_38 = arith.constant 0 : index
      %c0_39 = arith.constant 0 : index
      %72 = vector.load %arg8[%c0_38, %c0_39] : memref<1x8xf32, #tpu.memory_space<vmem>>, vector<1x8xf32>
      %73 = vector.shape_cast %72 : vector<1x8xf32> to vector<1x1x8xf32>
      %cst_40 = arith.constant dense<0.000000e+00> : vector<1xf32>
      %74 = vector.multi_reduction <add>, %73, %cst_40 [1, 2] : vector<1x1x8xf32> to vector<1xf32>
      %75 = vector.shape_cast %74 : vector<1xf32> to vector<1x1x1xf32>
      %76 = vector.extract %75[0, 0, 0] : f32 from vector<1x1x1xf32>
      %c0_41 = arith.constant 0 : index
      %c0_42 = arith.constant 0 : index
      %77 = vector.load %arg9[%c0_41, %c0_42] : memref<1x8xf32, #tpu.memory_space<vmem>>, vector<1x8xf32>
      %78 = vector.shape_cast %77 : vector<1x8xf32> to vector<1x1x8xf32>
      %cst_43 = arith.constant dense<0.000000e+00> : vector<1xf32>
      %79 = vector.multi_reduction <add>, %78, %cst_43 [1, 2] : vector<1x1x8xf32> to vector<1xf32>
      %80 = vector.shape_cast %79 : vector<1xf32> to vector<1x1x1xf32>
      %81 = vector.extract %80[0, 0, 0] : f32 from vector<1x1x1xf32>
      %c0_44 = arith.constant 0 : index
      %c0_45 = arith.constant 0 : index
      %82 = vector.load %arg10[%c0_44, %c0_45] : memref<1x8xf32, #tpu.memory_space<vmem>>, vector<1x8xf32>
      %83 = vector.shape_cast %82 : vector<1x8xf32> to vector<1x1x8xf32>
      %cst_46 = arith.constant dense<0.000000e+00> : vector<1xf32>
      %84 = vector.multi_reduction <add>, %83, %cst_46 [1, 2] : vector<1x1x8xf32> to vector<1xf32>
      %85 = vector.shape_cast %84 : vector<1xf32> to vector<1x1x1xf32>
      %86 = vector.extract %85[0, 0, 0] : f32 from vector<1x1x1xf32>
      %c0_i32_47 = arith.constant 0 : i32
      %87 = vector.broadcast %c0_i32_47 : i32 to vector<1x8x128xi32>
      %88 = arith.cmpi eq, %71, %87 : vector<1x8x128xi32>
      %c1_i32_48 = arith.constant 1 : i32
      %89 = vector.broadcast %c1_i32_48 : i32 to vector<1x8x128xi32>
      %90 = arith.cmpi eq, %71, %89 : vector<1x8x128xi32>
      %c2_i32 = arith.constant 2 : i32
      %91 = vector.broadcast %c2_i32 : i32 to vector<1x8x128xi32>
      %92 = arith.cmpi eq, %71, %91 : vector<1x8x128xi32>
      %cst_49 = arith.constant 0.000000e+00 : f32
      %93 = vector.broadcast %86 : f32 to vector<1x8x128xf32>
      %94 = vector.broadcast %cst_49 : f32 to vector<1x8x128xf32>
      %95 = arith.select %92, %93, %94 : vector<1x8x128xi1>, vector<1x8x128xf32>
      %96 = vector.broadcast %81 : f32 to vector<1x8x128xf32>
      %97 = arith.select %90, %96, %95 : vector<1x8x128xi1>, vector<1x8x128xf32>
      %98 = vector.broadcast %76 : f32 to vector<1x8x128xf32>
      %99 = arith.select %88, %98, %97 : vector<1x8x128xi1>, vector<1x8x128xf32>
      %c0_50 = arith.constant 0 : index
      %c0_51 = arith.constant 0 : index
      %c0_52 = arith.constant 0 : index
      %100 = vector.load %arg7[%c0_50, %c0_51, %c0_52] : memref<1x8x128xf32, #tpu.memory_space<vmem>>, vector<1x8x128xf32>
      tpu.vector_store %arg7[%c0_50, %c0_51, %c0_52], %99 {strides = array<i32>} : memref<1x8x128xf32, #tpu.memory_space<vmem>>, vector<1x8x128xf32>,
    } else {
    }
    return
  }
  func.func @transform_0(%arg0: i32, %arg1: i32) -> (i32, i32) {
    %c2_i32 = arith.constant 2 : i32
    %0 = arith.muli %arg0, %c2_i32 : i32
    %1 = arith.addi %0, %arg1 : i32
    %c0_i32 = arith.constant 0 : i32
    %c0_i32_0 = arith.constant 0 : i32
    return %1, %c0_i32 : i32, i32
  }
  func.func @transform_1(%arg0: i32, %arg1: i32) -> (i32, i32) {
    %c2_i32 = arith.constant 2 : i32
    %0 = arith.muli %arg0, %c2_i32 : i32
    %1 = arith.addi %0, %arg1 : i32
    %c0_i32 = arith.constant 0 : i32
    %c0_i32_0 = arith.constant 0 : i32
    return %1, %c0_i32 : i32, i32
  }
  func.func @transform_2(%arg0: i32, %arg1: i32) -> (i32, i32) {
    %c2_i32 = arith.constant 2 : i32
    %0 = arith.muli %arg0, %c2_i32 : i32
    %1 = arith.addi %0, %arg1 : i32
    %c0_i32 = arith.constant 0 : i32
    %c0_i32_0 = arith.constant 0 : i32
    return %1, %c0_i32 : i32, i32
  }
  func.func @transform_3(%arg0: i32, %arg1: i32) -> (i32, i32) {
    %c0_i32 = arith.constant 0 : i32
    %c0_i32_0 = arith.constant 0 : i32
    %c0_i32_1 = arith.constant 0 : i32
    return %c0_i32, %c0_i32_0 : i32, i32
  }
  func.func @transform_4(%arg0: i32, %arg1: i32) -> (i32, i32) {
    %c0_i32 = arith.constant 0 : i32
    %c0_i32_0 = arith.constant 0 : i32
    %c0_i32_1 = arith.constant 0 : i32
    return %c0_i32, %c0_i32_0 : i32, i32
  }
  func.func @transform_5(%arg0: i32, %arg1: i32) -> (i32, i32, i32) {
    %c0_i32 = arith.constant 0 : i32
    %c0_i32_0 = arith.constant 0 : i32
    %c0_i32_1 = arith.constant 0 : i32
    return %arg0, %c0_i32, %c0_i32_0 : i32, i32, i32
  }
}

module attributes {stable_mosaic.version = 11 : i64} {
  func.func @_ce_centroids_kernel(%arg0: i32, %arg1: i32, %arg2: memref<8x8xf32, #tpu.memory_space<vmem>>, %arg3: memref<8x32xf32, #tpu.memory_space<vmem>>, %arg4: memref<8x8xf32, #tpu.memory_space<vmem>>, %arg5: memref<32x8xf32, #tpu.memory_space<vmem>>, %arg6: memref<1x8xf32, #tpu.memory_space<vmem>>, %arg7: memref<1x8x128xf32, #tpu.memory_space<vmem>>, %arg8: memref<1x8xf32, #tpu.memory_space<vmem>>, %arg9: memref<1x8xf32, #tpu.memory_space<vmem>>, %arg10: memref<1x8xf32, #tpu.memory_space<vmem>>) attributes {dimension_semantics = [#tpu.dimension_semantics<parallel>, #tpu.dimension_semantics<arbitrary>], iteration_bounds = array<i64: 2, 2>, scalar_prefetch = 0 : i64, scratch_operands = 3 : i64, tpu.core_type = #tpu.core_type<tc>, window_params = [{transform_indices = @transform_0, window_bounds = array<i64: 8, 8>}, {transform_indices = @transform_1, window_bounds = array<i64: 8, 32>}, {transform_indices = @transform_2, window_bounds = array<i64: 8, 8>}, {pipeline_mode = #tpu.pipeline_mode<synchronous>, transform_indices = @transform_3, window_bounds = array<i64: 32, 8>}, {pipeline_mode = #tpu.pipeline_mode<synchronous>, transform_indices = @transform_4, window_bounds = array<i64: 1, 8>}, {transform_indices = @transform_5, window_bounds = array<i64: 1, 8, 128>}]} {
    %c0_i32 = arith.constant 0 : i32
    %0 = arith.cmpi eq, %arg1, %c0_i32 : i32
    %1 = arith.extui %0 : i1 to i32
    %c0_i32_0 = arith.constant 0 : i32
    %2 = arith.cmpi ne, %1, %c0_i32_0 : i32
    scf.if %2 {
      %cst_38 = arith.constant 0.000000e+00 : f32
      %71 = vector.broadcast %cst_38 : f32 to vector<1x8xf32>
      %c0_39 = arith.constant 0 : index
      %c0_40 = arith.constant 0 : index
      %72 = vector.load %arg8[%c0_39, %c0_40] : memref<1x8xf32, #tpu.memory_space<vmem>>, vector<1x8xf32>
      tpu.vector_store %arg8[%c0_39, %c0_40], %71 {strides = array<i32>} : memref<1x8xf32, #tpu.memory_space<vmem>>, vector<1x8xf32>,
      %cst_41 = arith.constant 0.000000e+00 : f32
      %73 = vector.broadcast %cst_41 : f32 to vector<1x8xf32>
      %c0_42 = arith.constant 0 : index
      %c0_43 = arith.constant 0 : index
      %74 = vector.load %arg9[%c0_42, %c0_43] : memref<1x8xf32, #tpu.memory_space<vmem>>, vector<1x8xf32>
      tpu.vector_store %arg9[%c0_42, %c0_43], %73 {strides = array<i32>} : memref<1x8xf32, #tpu.memory_space<vmem>>, vector<1x8xf32>,
      %cst_44 = arith.constant 0.000000e+00 : f32
      %75 = vector.broadcast %cst_44 : f32 to vector<1x8xf32>
      %c0_45 = arith.constant 0 : index
      %c0_46 = arith.constant 0 : index
      %76 = vector.load %arg10[%c0_45, %c0_46] : memref<1x8xf32, #tpu.memory_space<vmem>>, vector<1x8xf32>
      tpu.vector_store %arg10[%c0_45, %c0_46], %75 {strides = array<i32>} : memref<1x8xf32, #tpu.memory_space<vmem>>, vector<1x8xf32>,
    } else {
    }
    %c0 = arith.constant 0 : index
    %c0_1 = arith.constant 0 : index
    %3 = vector.load %arg2[%c0, %c0_1] : memref<8x8xf32, #tpu.memory_space<vmem>>, vector<8x8xf32>
    %c0_2 = arith.constant 0 : index
    %c0_3 = arith.constant 0 : index
    %4 = vector.load %arg4[%c0_2, %c0_3] : memref<8x8xf32, #tpu.memory_space<vmem>>, vector<8x8xf32>
    %c0_4 = arith.constant 0 : index
    %c0_5 = arith.constant 0 : index
    %5 = vector.load %arg3[%c0_4, %c0_5] : memref<8x32xf32, #tpu.memory_space<vmem>>, vector<8x32xf32>
    %c0_6 = arith.constant 0 : index
    %c0_7 = arith.constant 0 : index
    %6 = vector.load %arg5[%c0_6, %c0_7] : memref<32x8xf32, #tpu.memory_space<vmem>>, vector<32x8xf32>
    %c0_8 = arith.constant 0 : index
    %c0_9 = arith.constant 0 : index
    %7 = vector.load %arg6[%c0_8, %c0_9] : memref<1x8xf32, #tpu.memory_space<vmem>>, vector<1x8xf32>
    %cst = arith.constant dense<0xFF800000> : vector<8xf32>
    %8 = vector.multi_reduction <maximumf>, %3, %cst [1] : vector<8x8xf32> to vector<8xf32>
    %9 = vector.shape_cast %8 : vector<8xf32> to vector<8x1xf32>
    %10 = vector.broadcast %9 : vector<8x1xf32> to vector<8x8xf32>
    %11 = arith.subf %3, %10 : vector<8x8xf32>
    %12 = math.exp %11 : vector<8x8xf32>
    %cst_10 = arith.constant dense<0.000000e+00> : vector<8xf32>
    %13 = vector.multi_reduction <add>, %12, %cst_10 [1] : vector<8x8xf32> to vector<8xf32>
    %14 = vector.shape_cast %13 : vector<8xf32> to vector<8x1xf32>
    %15 = math.log %14 : vector<8x1xf32>
    %cst_11 = arith.constant 0.000000e+00 : f32
    %16 = vector.broadcast %cst_11 : f32 to vector<8x8xf32>
    %17 = arith.subf %16, %4 : vector<8x8xf32>
    %18 = vector.broadcast %15 : vector<8x1xf32> to vector<8x8xf32>
    %19 = arith.subf %11, %18 : vector<8x8xf32>
    %20 = arith.mulf %17, %19 : vector<8x8xf32>
    %21 = tpu.iota {dimensions = array<i32: 1>} : vector<8x8xi32>
    %cst_12 = arith.constant dense<0xFF800000> : vector<8xf32>
    %22 = vector.multi_reduction <maximumf>, %4, %cst_12 [1] : vector<8x8xf32> to vector<8xf32>
    %23 = vector.shape_cast %22 : vector<8xf32> to vector<8x1xf32>
    %24 = vector.broadcast %23 : vector<8x1xf32> to vector<8x8xf32>
    %25 = arith.cmpf oeq, %4, %24 : vector<8x8xf32>
    %c8_i32 = arith.constant 8 : i32
    %26 = vector.broadcast %c8_i32 : i32 to vector<8x8xi32>
    %27 = arith.select %25, %21, %26 : vector<8x8xi1>, vector<8x8xi32>
    %cst_13 = arith.constant dense<2147483647> : vector<8xi32>
    %28 = vector.multi_reduction <minsi>, %27, %cst_13 [1] : vector<8x8xi32> to vector<8xi32>
    %29 = vector.shape_cast %28 : vector<8xi32> to vector<8x1xi32>
    %30 = vector.broadcast %29 : vector<8x1xi32> to vector<8x8xi32>
    %31 = arith.cmpi eq, %21, %30 : vector<8x8xi32>
    %32 = arith.mulf %5, %5 : vector<8x32xf32>
    %cst_14 = arith.constant dense<0.000000e+00> : vector<8xf32>
    %33 = vector.multi_reduction <add>, %32, %cst_14 [1] : vector<8x32xf32> to vector<8xf32>
    %34 = vector.shape_cast %33 : vector<8xf32> to vector<8x1xf32>
    %cst_15 = arith.constant dense<0.000000e+00> : vector<8x8xf32>
    %35 = tpu.matmul %5, %6, %cst_15 {dimension_numbers = #tpu.dot_dimension_numbers<[1], [0], [0], [1], [0, 0, 1, 1], [], []>} : vector<8x32xf32>, vector<32x8xf32>, vector<8x8xf32> -> vector<8x8xf32>
    %36 = vector.broadcast %34 : vector<8x1xf32> to vector<8x8xf32>
    %37 = vector.broadcast %7 : vector<1x8xf32> to vector<8x8xf32>
    %38 = arith.addf %36, %37 : vector<8x8xf32>
    %cst_16 = arith.constant 2.000000e+00 : f32
    %39 = vector.broadcast %cst_16 : f32 to vector<8x8xf32>
    %40 = arith.mulf %39, %35 : vector<8x8xf32>
    %41 = arith.subf %38, %40 : vector<8x8xf32>
    %cst_17 = arith.constant 0.000000e+00 : f32
    %42 = vector.broadcast %cst_17 : f32 to vector<8x8xf32>
    %43 = arith.maximumf %41, %42 : vector<8x8xf32>
    %44 = math.sqrt %43 : vector<8x8xf32>
    %cst_18 = arith.constant 1.000000e+01 : f32
    %45 = vector.broadcast %cst_18 : f32 to vector<8x8xf32>
    %46 = arith.subf %45, %44 : vector<8x8xf32>
    %cst_19 = arith.constant 0.000000e+00 : f32
    %47 = vector.broadcast %cst_19 : f32 to vector<8x8xf32>
    %48 = arith.maximumf %46, %47 : vector<8x8xf32>
    %c0_20 = arith.constant 0 : index
    %c0_21 = arith.constant 0 : index
    %49 = vector.load %arg8[%c0_20, %c0_21] : memref<1x8xf32, #tpu.memory_space<vmem>>, vector<1x8xf32>
    %cst_22 = arith.constant dense<0.000000e+00> : vector<8xf32>
    %50 = vector.multi_reduction <add>, %20, %cst_22 [0] : vector<8x8xf32> to vector<8xf32>
    %51 = vector.shape_cast %50 : vector<8xf32> to vector<1x8xf32>
    %52 = arith.addf %49, %51 : vector<1x8xf32>
    %c0_23 = arith.constant 0 : index
    %c0_24 = arith.constant 0 : index
    %53 = vector.load %arg8[%c0_23, %c0_24] : memref<1x8xf32, #tpu.memory_space<vmem>>, vector<1x8xf32>
    tpu.vector_store %arg8[%c0_23, %c0_24], %52 {strides = array<i32>} : memref<1x8xf32, #tpu.memory_space<vmem>>, vector<1x8xf32>,
    %c0_25 = arith.constant 0 : index
    %c0_26 = arith.constant 0 : index
    %54 = vector.load %arg9[%c0_25, %c0_26] : memref<1x8xf32, #tpu.memory_space<vmem>>, vector<1x8xf32>
    %cst_27 = arith.constant 0.000000e+00 : f32
    %55 = vector.broadcast %cst_27 : f32 to vector<8x8xf32>
    %56 = arith.select %31, %43, %55 : vector<8x8xi1>, vector<8x8xf32>
    %cst_28 = arith.constant dense<0.000000e+00> : vector<8xf32>
    %57 = vector.multi_reduction <add>, %56, %cst_28 [0] : vector<8x8xf32> to vector<8xf32>
    %58 = vector.shape_cast %57 : vector<8xf32> to vector<1x8xf32>
    %59 = arith.addf %54, %58 : vector<1x8xf32>
    %c0_29 = arith.constant 0 : index
    %c0_30 = arith.constant 0 : index
    %60 = vector.load %arg9[%c0_29, %c0_30] : memref<1x8xf32, #tpu.memory_space<vmem>>, vector<1x8xf32>
    tpu.vector_store %arg9[%c0_29, %c0_30], %59 {strides = array<i32>} : memref<1x8xf32, #tpu.memory_space<vmem>>, vector<1x8xf32>,
    %c0_31 = arith.constant 0 : index
    %c0_32 = arith.constant 0 : index
    %61 = vector.load %arg10[%c0_31, %c0_32] : memref<1x8xf32, #tpu.memory_space<vmem>>, vector<1x8xf32>
    %cst_33 = arith.constant 1.000000e+01 : f32
    %62 = vector.broadcast %cst_33 : f32 to vector<8x8xf32>
    %63 = arith.select %31, %62, %48 : vector<8x8xi1>, vector<8x8xf32>
    %cst_34 = arith.constant dense<0.000000e+00> : vector<8xf32>
    %64 = vector.multi_reduction <add>, %63, %cst_34 [0] : vector<8x8xf32> to vector<8xf32>
    %65 = vector.shape_cast %64 : vector<8xf32> to vector<1x8xf32>
    %66 = arith.addf %61, %65 : vector<1x8xf32>
    %c0_35 = arith.constant 0 : index
    %c0_36 = arith.constant 0 : index
    %67 = vector.load %arg10[%c0_35, %c0_36] : memref<1x8xf32, #tpu.memory_space<vmem>>, vector<1x8xf32>
    tpu.vector_store %arg10[%c0_35, %c0_36], %66 {strides = array<i32>} : memref<1x8xf32, #tpu.memory_space<vmem>>, vector<1x8xf32>,
    %c1_i32 = arith.constant 1 : i32
    %68 = arith.cmpi eq, %arg1, %c1_i32 : i32
    %69 = arith.extui %68 : i1 to i32
    %c0_i32_37 = arith.constant 0 : i32
    %70 = arith.cmpi ne, %69, %c0_i32_37 : i32
    scf.if %70 {
      %71 = tpu.iota {dimensions = array<i32: 2>} : vector<1x8x128xi32>
      %c0_38 = arith.constant 0 : index
      %c0_39 = arith.constant 0 : index
      %72 = vector.load %arg8[%c0_38, %c0_39] : memref<1x8xf32, #tpu.memory_space<vmem>>, vector<1x8xf32>
      %73 = vector.shape_cast %72 : vector<1x8xf32> to vector<1x1x8xf32>
      %cst_40 = arith.constant dense<0.000000e+00> : vector<1xf32>
      %74 = vector.multi_reduction <add>, %73, %cst_40 [1, 2] : vector<1x1x8xf32> to vector<1xf32>
      %75 = vector.shape_cast %74 : vector<1xf32> to vector<1x1x1xf32>
      %76 = vector.extract %75[0, 0, 0] : f32 from vector<1x1x1xf32>
      %c0_41 = arith.constant 0 : index
      %c0_42 = arith.constant 0 : index
      %77 = vector.load %arg9[%c0_41, %c0_42] : memref<1x8xf32, #tpu.memory_space<vmem>>, vector<1x8xf32>
      %78 = vector.shape_cast %77 : vector<1x8xf32> to vector<1x1x8xf32>
      %cst_43 = arith.constant dense<0.000000e+00> : vector<1xf32>
      %79 = vector.multi_reduction <add>, %78, %cst_43 [1, 2] : vector<1x1x8xf32> to vector<1xf32>
      %80 = vector.shape_cast %79 : vector<1xf32> to vector<1x1x1xf32>
      %81 = vector.extract %80[0, 0, 0] : f32 from vector<1x1x1xf32>
      %c0_44 = arith.constant 0 : index
      %c0_45 = arith.constant 0 : index
      %82 = vector.load %arg10[%c0_44, %c0_45] : memref<1x8xf32, #tpu.memory_space<vmem>>, vector<1x8xf32>
      %83 = vector.shape_cast %82 : vector<1x8xf32> to vector<1x1x8xf32>
      %cst_46 = arith.constant dense<0.000000e+00> : vector<1xf32>
      %84 = vector.multi_reduction <add>, %83, %cst_46 [1, 2] : vector<1x1x8xf32> to vector<1xf32>
      %85 = vector.shape_cast %84 : vector<1xf32> to vector<1x1x1xf32>
      %86 = vector.extract %85[0, 0, 0] : f32 from vector<1x1x1xf32>
      %c0_i32_47 = arith.constant 0 : i32
      %87 = vector.broadcast %c0_i32_47 : i32 to vector<1x8x128xi32>
      %88 = arith.cmpi eq, %71, %87 : vector<1x8x128xi32>
      %c1_i32_48 = arith.constant 1 : i32
      %89 = vector.broadcast %c1_i32_48 : i32 to vector<1x8x128xi32>
      %90 = arith.cmpi eq, %71, %89 : vector<1x8x128xi32>
      %c2_i32 = arith.constant 2 : i32
      %91 = vector.broadcast %c2_i32 : i32 to vector<1x8x128xi32>
      %92 = arith.cmpi eq, %71, %91 : vector<1x8x128xi32>
      %cst_49 = arith.constant 0.000000e+00 : f32
      %93 = vector.broadcast %86 : f32 to vector<1x8x128xf32>
      %94 = vector.broadcast %cst_49 : f32 to vector<1x8x128xf32>
      %95 = arith.select %92, %93, %94 : vector<1x8x128xi1>, vector<1x8x128xf32>
      %96 = vector.broadcast %81 : f32 to vector<1x8x128xf32>
      %97 = arith.select %90, %96, %95 : vector<1x8x128xi1>, vector<1x8x128xf32>
      %98 = vector.broadcast %76 : f32 to vector<1x8x128xf32>
      %99 = arith.select %88, %98, %97 : vector<1x8x128xi1>, vector<1x8x128xf32>
      %c0_50 = arith.constant 0 : index
      %c0_51 = arith.constant 0 : index
      %c0_52 = arith.constant 0 : index
      %100 = vector.load %arg7[%c0_50, %c0_51, %c0_52] : memref<1x8x128xf32, #tpu.memory_space<vmem>>, vector<1x8x128xf32>
      tpu.vector_store %arg7[%c0_50, %c0_51, %c0_52], %99 {strides = array<i32>} : memref<1x8x128xf32, #tpu.memory_space<vmem>>, vector<1x8x128xf32>,
    } else {
    }
    return
  }
  func.func @transform_0(%arg0: i32, %arg1: i32) -> (i32, i32) {
    %c2_i32 = arith.constant 2 : i32
    %0 = arith.muli %arg0, %c2_i32 : i32
    %1 = arith.addi %0, %arg1 : i32
    %c0_i32 = arith.constant 0 : i32
    %c0_i32_0 = arith.constant 0 : i32
    return %1, %c0_i32 : i32, i32
  }
  func.func @transform_1(%arg0: i32, %arg1: i32) -> (i32, i32) {
    %c2_i32 = arith.constant 2 : i32
    %0 = arith.muli %arg0, %c2_i32 : i32
    %1 = arith.addi %0, %arg1 : i32
    %c0_i32 = arith.constant 0 : i32
    %c0_i32_0 = arith.constant 0 : i32
    return %1, %c0_i32 : i32, i32
  }
  func.func @transform_2(%arg0: i32, %arg1: i32) -> (i32, i32) {
    %c2_i32 = arith.constant 2 : i32
    %0 = arith.muli %arg0, %c2_i32 : i32
    %1 = arith.addi %0, %arg1 : i32
    %c0_i32 = arith.constant 0 : i32
    %c0_i32_0 = arith.constant 0 : i32
    return %1, %c0_i32 : i32, i32
  }
  func.func @transform_3(%arg0: i32, %arg1: i32) -> (i32, i32) {
    %c0_i32 = arith.constant 0 : i32
    %c0_i32_0 = arith.constant 0 : i32
    %c0_i32_1 = arith.constant 0 : i32
    return %c0_i32, %c0_i32_0 : i32, i32
  }
  func.func @transform_4(%arg0: i32, %arg1: i32) -> (i32, i32) {
    %c0_i32 = arith.constant 0 : i32
    %c0_i32_0 = arith.constant 0 : i32
    %c0_i32_1 = arith.constant 0 : i32
    return %c0_i32, %c0_i32_0 : i32, i32
  }
  func.func @transform_5(%arg0: i32, %arg1: i32) -> (i32, i32, i32) {
    %c0_i32 = arith.constant 0 : i32
    %c0_i32_0 = arith.constant 0 : i32
    %c0_i32_1 = arith.constant 0 : i32
    return %arg0, %c0_i32, %c0_i32_0 : i32, i32, i32
  }
}

</mosaic_0001>

<bundles_post_ra>
// kernel: tpu_custom_call.1
= control target key start
LH: loop header
LB: loop body
LE: loop exit
PB: predicated region body
PF: predicated region fallthrough
CT: control target
= control target key end

     0   :  { %10 = vsyncpa [#allocation6], 0  ;;  %s1098_s0 = inlined_call_operand.vmem [shape: f32[32,8], index: 0, kind: input, shape index: {}]   ;;  %s1099_s1 = inlined_call_operand.vmem [shape: f32[32,32], index: 1, kind: input, shape index: {}]   ;;  %s1100_s2 = inlined_call_operand.vmem [shape: f32[32,8], index: 2, kind: input, shape index: {}]   ;;  %s1101_s3 = inlined_call_operand.vmem [shape: f32[32,8], index: 3, kind: input, shape index: {}]   ;;  %s1102_s4 = inlined_call_operand.vmem [shape: f32[1,8], index: 4, kind: input, shape index: {}]   ;;  %s1103_s5 = inlined_call_operand.hbm [shape: f32[2,8,128], index: 5, kind: output, shape index: {}]  }
   0x1   :  { %12 = vsyncpa [#allocation6 + $0x1], 0  ;;  %s913_s18 = smov 0   ;;  %s915_s19 = smov 0  }
   0x2   :  { %s917_s20 = smov 0   ;;  %s919_s21 = smov 0  }
   0x3   :  { %s921_s22 = smov 0   ;;  %s923_s23 = smov 0  }
   0x4   :  { %s925_s24 = smov 0   ;;  %s927_s25 = smov 0  }
   0x5 LB: > { %s647_s26 = sadd.s32 4294967295, %s876_s25   ;;  %s648_s27 = sadd.s32 4294967294, %s876_s25   ;;  %s876_s25 = sphi %s927_s25, %s18_s25   ;;  %s872_s24 = sphi %s925_s24, %s1117_s24   ;;  %s868_s23 = sphi %s923_s23, %s1116_s23   ;;  %s864_s22 = sphi %s921_s22, %s1115_s22   ;;  %s860_s21 = sphi %s919_s21, %s1114_s21   ;;  %s856_s20 = sphi %s917_s20, %s1113_s20   ;;  %s852_s19 = sphi %s915_s19, %s1112_s19   ;;  %s848_s18 = sphi %s913_s18, %s1111_s18  }
   0x6   : > { %s27_s28 = sadd.s32 1, %s868_s23  ;;  %s30_s29 = sadd.s32 1, %s872_s24 }
   0x7   : > { %p28_p0 = scmp.ge.s32.totalorder %s27_s28, 2  ;;  %p179_p1 = scmp.ne.s32.totalorder %s856_s20, %s852_s19 }
   0x8   : > { %p180_p2 = scmp.eq.s32.totalorder %s647_s26, 3  ;;  %p185_p4 = scmp.ne.s32.totalorder %s852_s19, %s848_s18 }
   0x9   : > { %s1119_s28 = smov (%p28_p0, %s27_s28), 0  ;;  %s1121_s29 = smov (!%p28_p0, %s30_s29), %s872_s24 }
   0xa   : > { %p962_p3 = por %p180_p2, %p179_p1  ;;  %p32_p5 = scmp.ge.s32.totalorder %s1121_s29, 2 }
   0xb   : > { %p186_p6 = scmp.eq.s32.totalorder %s648_s27, 3  ;;  %p657_p7 = scmp.ge.s32.totalorder %s876_s25, 1 }
   0xc   : > { %p243_p8 = scmp.lt.s32.totalorder %s876_s25, 5  ;;  %s1123_s29 = smov (%p32_p5, %s1121_s29), 0 }
   0xd   : > { %1107 = sst [smem:[#allocation8_spill]] %s1123_s29  ;;  %p972_p9 = por %p186_p6, %p185_p4 }
   0xe   : > { %p244_p10 = pnand %p657_p7, %p243_p8  ;;  %s166_s7 = ssub.s32 %s872_s24, %s1123_s29 }
   0xf   : > { %s169_s8 = sadd.s32 1, %s856_s20  ;;  %p167_p11 = scmp.eq.s32.totalorder %s166_s7, 0 }
  0x10   : > { %247 = sbr.rel (%p244_p10) target bundleno = 732 (0x2dc), region = 40  ;;  %s1104_s10 = sand.u32 (!%p244_p10), 1, %s852_s19  }
  0x11   : > { %s980_s9 = scalar_select %p167_p11, %s856_s20, %s169_s8  }
  0x12   : > { %s659_s11 = sshll.u32 (!%p244_p10), %s864_s22, 1  ;;  %s986_s12 = sshll.u32 (!%p244_p10), %s1104_s10, 3 }
  0x13   : > { %s285_s13 = sadd.s32 (!%p244_p10), %s860_s21, %s659_s11  ;;  %s283_s11 = scalar_lea.vmem (!%p244_p10), [#allocation5], %s986_s12 }
  0x14   : > { %p286_p12 = scmp.lt.s32.totalorder (!%p244_p10), %s285_s13, 3  ;;  %p665_p13 = scmp.ne.s32.totalorder (!%p244_p10), %s860_s21, 0 }
  0x17   : > { %s1125_s13 = smov (!%p286_p12, %s285_s13), 3  ;;  %311 = sbr.rel (%p665_p13) target bundleno = 30 (0x1e), region = 44 }
  0x18   : > { %s989_s14 = sshll.u32 %s1125_s13, 3  ;;  %vm312_vm0 = vcmask (!%p665_p13), 57344   ;;  %v878_v0 = vmov (!%p665_p13), 0.0  }
  0x19   : > { %s289_s17 = scalar_lea.vmem %s1098_s0, %s989_s14  ;;  %s297_s7 = scalar_lea.vmem %s1099_s1, %s989_s14  ;;  %313 = vst.msk [vmem:[#allocation2] sm:$0x1] (!%p665_p13), %vm312_vm0, %v878_v0  ;;  %314 = vst.msk [vmem:[#allocation3] sm:$0x1] (!%p665_p13), %vm312_vm0, %v878_v0 }
  0x1a   : > { %s305_s29 = scalar_lea.vmem %s1100_s2, %s989_s14  ;;  %315 = vst.msk [vmem:[#allocation4] sm:$0x1] (!%p665_p13), %vm312_vm0, %v878_v0 }
  0x1e PF: > { %v317_v1 = vld [vmem:[%s305_s29] sm:$0xff]  ;;  %vm324_vm1 = vcmask 64512   ;;  %v320_v6 = vld [vmem:[%s1101_s3 + $0x8] sm:$0xff]  ;;  %v321_v7 = vld [vmem:[%s1101_s3 + $0x10] sm:$0xff]  ;;  %v879_v8 = vmov 0.0|0.0   ;;  %vm880_vm2 = vmmov 0   ;;  %v339_v16 = vlaneseq }
  0x1f   : > { %v316_v2 = vld [vmem:[%s289_s17] sm:$0xff]  ;;  %v341_v3 = vsel %vm324_vm1, %v317_v1, -inf  ;;  %689 = vmatprep.subr.bf16.mxu0 %v879_v8  ;;  %v322_v10 = vld [vmem:[%s1101_s3 + $0x18] sm:$0xff]  ;;  %v881_v11 = vmov 0.0   ;;  %vm363_vm3 = vcmask 261120   ;;  %v336_v36 = vsub.f32 0.0, %v317_v1 }
  0x20   : > { %342 = vmax.xlane.f32.xlu0 %v341_v3  ;;  %v325_v4 = vsel %vm324_vm1, %v316_v2, -inf  ;;  %v319_v5 = vld [vmem:[%s1101_s3] sm:$0xff]  ;;  %686 = vmatprep.mubr.msk.f32.mxu0 %vm880_vm2, %v881_v11  ;;  %v693_v14 = vpack.c.bf16 %v322_v10, %v321_v7  ;;  %v1019_v17 = vand.u32 127, %v339_v16  ;;  %vm468_vm6 = vcmask 57344   ;;  %p668_p0 = scmp.ne.s32.totalorder %s860_s21, 1 }
  0x21   : > { %v690_v9 = vpack.c.bf16 %v320_v6, %v319_v5  ;;  %v318_v12 = vld [vmem:[%s297_s7] sm:$0xff] }
  0x22   : > { %v362_v13 = vmul.f32 %v318_v12, %v318_v12  ;;  %v459_v46 = vld [vmem:[#allocation2] sm:$0x1]  ;;  %vm531_vm10 = vcmp.eq.s32.totalorder (!%p668_p0), %v1019_v17, 2  ;;  %vm530_vm11 = vcmp.eq.s32.totalorder (!%p668_p0), %v1019_v17, 1  ;;  %vm529_vm12 = vcmp.eq.s32.totalorder (!%p668_p0), %v1019_v17, 0 }
  0x23   : > { %691 = vmatpush3.bf16.msra.mxu0 %v690_v9  ;;  %v667_v49 = vld [vmem:[%s1102_s4] ss:$0 sm:$0xff] }
  0x24   : > { %326 = vmax.xlane.f32.xlu0 %v325_v4  ;;  %692 = vmatprep.subr.bf16.mxu0 %v879_v8  ;;  %v364_v15 = vsel %vm363_vm3, %v362_v13, 0.0 }
  0x27   : > { %694 = vmatpush3.bf16.msra.mxu0 %v693_v14 }
  0x2a   : > { %687 = vmatmul.mubr.msk.f32.vlgmr.msra.gmra.mrb[0].mxu0 %vm363_vm3, %v318_v12 }
  0xad   : > { %v343_v18 = vpop.xlane.xlu0 %342 }
  0xae   : > { %vm344_vm4 = vcmp.eq.f32.partialorder %v317_v1, %v343_v18  ;;  %v470_v18 = vld [vmem:[#allocation3] sm:$0x1] }
  0xaf   : > { %v345_v19 = vsel %vm344_vm4, %v1019_v17, 8 }
  0xb0   : > { %v346_v20 = vsel %vm324_vm1, %v345_v19, 2147483647  ;;  %v481_v19 = vld [vmem:[#allocation4] sm:$0x1] }
  0xb1   : > { %v327_v21 = vpop.xlane.xlu0 %326  ;;  %v348_v22 = vshra.s32 %v346_v20, 16  ;;  %v347_v30 = vand.u32 65535, %v346_v20 }
  0xb2   : > { %v328_v23 = vsub.f32 %v316_v2, %v327_v21 }
  0xb3   : > { %v350_v24 = vcvt.s32.f32 %v348_v22  ;;  %v349_v32 = vcvt.s32.f32 %v347_v30 }
  0xb4   : > { %v329_v25 = vmul.f32 1.442695, %v328_v23 }
  0xb5   : > { %351 = vmin.xlane.f32.xlu1 %v350_v24 }
  0xb6   : > { %776 = vpow2.f32 %v329_v25 }
  0xb9   : > { %365 = vadd.xlane.f32.xlu1 %v364_v15 }
  0xc0   : > { %v777_v26 = vpop.eup %776 }
  0xc1   : > { %v331_v27 = vsel %vm324_vm1, %v777_v26, 0.0 }
  0xc2   : > { %332 = vadd.xlane.f32.xlu0 %v331_v27 }
  0xfd   : > { %v436_v28 = vpop.f32.mrb[0].mxu0 }
  0xfe   : > { %v688_v29 = vpop.f32.mrb[1].mxu0  ;;  %v447_v51 = vmul.f32 2.0, %v436_v28 }
 0x142   : > { %v352_v31 = vpop.xlane.xlu1 %351 }
 0x143   : > { %vm353_vm5 = vcmp.eq.f32.partialorder %v350_v24, %v352_v31  ;;  %v358_v59 = vcvt.f32.s32 %v352_v31 }
 0x144   : > { %v354_v33 = vsel %vm353_vm5, %v349_v32, inf }
 0x145   : > { %355 = vmin.xlane.f32.xlu1 %v354_v33  ;;  %v359_v63 = vshll.u32 %v358_v59, 16 }
 0x146   : > { %v366_v50 = vpop.xlane.xlu1 %365 }
 0x147   : > { %v446_v52 = vadd.f32 %v667_v49, %v366_v50 }
 0x149   : > { %v448_v53 = vsub.f32 %v446_v52, %v447_v51 }
 0x14b   : > { %v449_v54 = vmax.f32 %v448_v53, 0.0 }
 0x14d   : > { %vm452_vm7 = vcmp.eq.f32.partialorder %v449_v54, inf  ;;  %v455_v57 = vand.u32 2147483648, %v449_v54  ;;  %vm454_vm8 = vcmp.eq.f32.partialorder %v449_v54, 0.0 }
 0x14f   : > { %v333_v34 = vpop.xlane.xlu0 %332 }
 0x150   : > { %778 = vlog2.f32 %v333_v34 }
 0x151   : > { %780 = vrsqrt.f32 %v449_v54 }
 0x15a   : > { %v779_v35 = vpop.eup %778 }
 0x15b   : > { %v335_v37 = vmul.f32 0.6931472, %v779_v35  ;;  %v781_v55 = vpop.eup %780 }
 0x15c   : > { %v451_v56 = vmul.f32 %v781_v55, %v449_v54 }
 0x15d   : > { %v337_v38 = vsub.f32 %v328_v23, %v335_v37 }
 0x15e   : > { %v453_v58 = vsel %vm452_vm7, %v449_v54, %v451_v56 }
 0x15f   : > { %v338_v39 = vmul.f32 %v337_v38, %v336_v36  ;;  %v456_v60 = vsel %vm454_vm8, %v455_v57, %v453_v58 }
 0x160   : > { %v457_v61 = vsub.f32 10.0, %v456_v60 }
 0x161   : > { %v460_v40 = vsel %vm324_vm1, %v338_v39, 0.0 }
 0x162   : > { %v461_v41 = vrot.slane %v460_v40, 4  ;;  %v458_v2 = vmax.f32 %v457_v61, 0.0 }
 0x164   : > { %v462_v42 = vadd.f32 %v461_v41, %v460_v40 }
 0x166   : > { %v463_v43 = vrot.slane %v462_v42, 2 }
 0x168   : > { %v464_v44 = vadd.f32 %v463_v43, %v462_v42 }
 0x16a   : > { %v465_v45 = vrot.slane %v464_v44, 1 }
 0x16c   : > { %v466_v47 = vadd.f32 %v465_v45, %v464_v44 }
 0x16e   : > { %v467_v48 = vadd.f32 %v466_v47, %v459_v46 }
 0x170   : > { %469 = vst.msk [vmem:[#allocation2] sm:$0x1] %vm468_vm6, %v467_v48 }
 0x177   : > { %v496_v25 = vld [vmem:[#allocation2] sm:$0x1] (!%p668_p0) }
 0x178   : > { %v497_v28 = vsel (!%p668_p0), %vm468_vm6, %v496_v25, 0.0 }
 0x179   : > { %498 = vadd.xlane.f32.xlu0 (!%p668_p0), %v497_v28 }
 0x1d2   : > { %v356_v62 = vpop.xlane.xlu1 %355 }
 0x1d3   : > { %v357_v0 = vcvt.f32.s32 %v356_v62 }
 0x1d5   : > { %v360_v1 = vadd.s32 %v359_v63, %v357_v0 }
 0x1d7   : > { %vm361_vm9 = vcmp.eq.s32.totalorder %v1019_v17, %v360_v1 }
 0x1d8   : > { %v471_v3 = vsel %vm361_vm9, %v449_v54, 0.0  ;;  %v482_v4 = vsel %vm361_vm9, 10.0, %v458_v2 }
 0x1d9   : > { %v472_v5 = vsel %vm324_vm1, %v471_v3, 0.0  ;;  %v483_v6 = vsel %vm324_vm1, %v482_v4, 0.0 }
 0x1da   : > { %v473_v7 = vrot.slane %v472_v5, 4  ;;  %v484_v8 = vrot.slane %v483_v6, 4 }
 0x1dc   : > { %v474_v9 = vadd.f32 %v473_v7, %v472_v5  ;;  %v485_v10 = vadd.f32 %v484_v8, %v483_v6 }
 0x1de   : > { %v475_v11 = vrot.slane %v474_v9, 2  ;;  %v486_v12 = vrot.slane %v485_v10, 2 }
 0x1e0   : > { %v476_v13 = vadd.f32 %v475_v11, %v474_v9  ;;  %v487_v14 = vadd.f32 %v486_v12, %v485_v10 }
 0x1e2   : > { %v477_v15 = vrot.slane %v476_v13, 1  ;;  %v488_v16 = vrot.slane %v487_v14, 1  ;;  %495 = sbr.rel (%p668_p0) target bundleno = 707 (0x2c3), region = 48 }
 0x1e4   : > { %v478_v20 = vadd.f32 %v477_v15, %v476_v13  ;;  %v489_v21 = vadd.f32 %v488_v16, %v487_v14 }
 0x1e6   : > { %v479_v22 = vadd.f32 %v478_v20, %v470_v18  ;;  %v490_v23 = vadd.f32 %v489_v21, %v481_v19 }
 0x1e8   : > { %480 = vst.msk [vmem:[#allocation3] sm:$0x1] %vm468_vm6, %v479_v22  ;;  %491 = vst.msk [vmem:[#allocation4] sm:$0x1] %vm468_vm6, %v490_v23 }
 0x1ef   : > { %v518_v24 = vld [vmem:[#allocation4] sm:$0x1]  ;;  %v507_v26 = vld [vmem:[#allocation3] sm:$0x1] }
 0x1f0   : > { %v519_v27 = vsel %vm468_vm6, %v518_v24, 0.0  ;;  %v508_v29 = vsel %vm468_vm6, %v507_v26, 0.0 }
 0x1f1   : > { %520 = vadd.xlane.f32.xlu1 %v519_v27  ;;  %509 = vadd.xlane.f32.xlu0 %v508_v29 }
 0x206   : > { %v499_v31 = vpop.xlane.xlu0 %498 }
 0x207   : > { %v500_v33 = vrot.slane %v499_v31, 4 }
 0x209   : > { %v501_v35 = vadd.f32 %v500_v33, %v499_v31 }
 0x20b   : > { %v502_v38 = vrot.slane %v501_v35, 2 }
 0x20d   : > { %v503_v41 = vadd.f32 %v502_v38, %v501_v35 }
 0x20f   : > { %v504_v44 = vrot.slane %v503_v41, 1 }
 0x211   : > { %v505_v46 = vadd.f32 %v504_v44, %v503_v41 }
 0x213   : > { %695 = vpush %v505_v46 }
 0x244   : > { %s696_s21 = spop %695 }
 0x245   : > { %v536_v54 = vstv %s696_s21 }
 0x27e   : > { %v521_v30 = vpop.xlane.xlu1 %520  ;;  %v510_v36 = vpop.xlane.xlu0 %509 }
 0x27f   : > { %v522_v32 = vrot.slane %v521_v30, 4  ;;  %v511_v39 = vrot.slane %v510_v36, 4 }
 0x281   : > { %v523_v34 = vadd.f32 %v522_v32, %v521_v30  ;;  %v512_v40 = vadd.f32 %v511_v39, %v510_v36 }
 0x283   : > { %v524_v37 = vrot.slane %v523_v34, 2  ;;  %v513_v43 = vrot.slane %v512_v40, 2 }
 0x285   : > { %v525_v42 = vadd.f32 %v524_v37, %v523_v34  ;;  %v514_v45 = vadd.f32 %v513_v43, %v512_v40 }
 0x287   : > { %v526_v47 = vrot.slane %v525_v42, 1  ;;  %v515_v48 = vrot.slane %v514_v45, 1 }
 0x289   : > { %v516_v49 = vadd.f32 %v515_v48, %v514_v45  ;;  %v527_v50 = vadd.f32 %v526_v47, %v525_v42 }
 0x28b   : > { %697 = vpush %v516_v49 }
 0x28c   : > { %699 = vpush %v527_v50 }
 0x2bc   : > { %s698_s8 = spop %697 }
 0x2bd   : > { %v534_v51 = vstv %s698_s8  ;;  %s700_s10 = spop %699 }
 0x2be   : > { %v532_v52 = vstv %s700_s10 }
 0x2bf   : > { %v533_v53 = vsel %vm531_vm10, %v532_v52, 0.0 }
 0x2c0   : > { %v535_v55 = vsel %vm530_vm11, %v534_v51, %v533_v53 }
 0x2c1   : > { %v537_v56 = vsel %vm529_vm12, %v536_v54, %v535_v55 }
 0x2c2   : > { %538 = vst [vmem:[%s283_s11] sm:$0xff] %v537_v56 }
 0x2c3 PF: > { %s670_s13 = sshll.u32 %s864_s22, 7  ;;  %s553_s26 = sshll.u32 %s283_s11, 4  ;;  %s554_s26 = int_to_ptr.vmem [resolvable:$true] %s553_s26 }
 0x2c4   : > { %s1047_s16 = scalar_lea.hbm %s1103_s5, %s670_s13  ;;  %s1109_s29 = sand.u32 1, %s852_s19  }
 0x2c5   : > { %s540_s17 = scalar_lea.sflag [#allocation6], %s1109_s29  ;;  %s782_s27 = scalar_lea.vmem %s554_s26, 128 }
 0x2c6   : > { %p783_p1 = scmp.ne.s32.totalorder %s554_s26, %s782_s27  ;;  %s882_s7 = smov [#allocation5]  }
 0x2c7   : > { %s786_s21 = sshll.u32 %s882_s7, 4  ;;  %s787_s21 = int_to_ptr.vmem [resolvable:$false] %s786_s21 }
 0x2c8   : > { %p784_p2 = pnand %p783_p1, %p962_p3  ;;  %s788_s8 = scalar_lea.vmem %s787_s21, 256 }
 0x2c9   : > { %p789_p5 = scmp.lt.s32.totalorder %s554_s26, %s787_s21  ;;  %p790_p6 = scmp.lt.s32.totalorder %s788_s8, %s782_s27 }
 0x2ca   : > { %p785_p4 = pneg %p784_p2 }
 0x2cb   : > { %p791_p7 = por %p790_p6, %p789_p5 }
 0x2cd   : > { %p792_p8 = pnand %p791_p7, %p785_p4 }
 0x2cf   : > { %795 = shalt.err (!%p792_p8)
}
 0x2d0   : > { %s796_s22 = scalar_lea.hbm %s1047_s16, 128  ;;  %s800_s10 = scalar_lea.hbm %s1103_s5, 256 }
 0x2d1   : > { %p797_p10 = scmp.ne.s32.totalorder %s1047_s16, %s796_s22  ;;  %p801_p13 = scmp.lt.u32.totalorder %s1047_s16, %s1103_s5 }
 0x2d2   : > { %p802_p0 = scmp.lt.u32.totalorder %s800_s10, %s796_s22  ;;  %p804_p2 = scmp.lt.u32.totalorder %s796_s22, %s1047_s16 }
 0x2d3   : > { %p798_p11 = pnand %p797_p10, %p962_p3 }
 0x2d4   : > { %p803_p1 = por %p802_p0, %p801_p13 }
 0x2d5   : > { %p799_p12 = pneg %p798_p11 }
 0x2d6   : > { %p805_p4 = por %p804_p2, %p803_p1 }
 0x2d8   : > { %p806_p5 = pnand %p805_p4, %p799_p12 }
 0x2da   : > { %809 = shalt.err (!%p806_p5)
}
 0x2db   : > { %701 = dma.vmem_to_hbm [thread:$0]  (%p962_p3), %s554_s26, 128, %s1047_s16, %s540_s17  }
 0x2dc PF: > { %p707_p6 = scmp.ge.s32.totalorder %s876_s25, 2  ;;  %s565_s15 = sand.u32 1, %s848_s18  }
 0x2dd   : > { %s566_s29 = scalar_lea.sflag [#allocation6], %s565_s15 }
 0x2de   : > { %p704_p7 = pnand %p707_p6, %p972_p9 }
 0x2e0   : > { %843 = dma.done.wait (!%p704_p7), %s566_s29, 128  }
 0x2e1   : > { %845 = vsyncadd (!%p704_p7), %s566_s29, 4294967168  ;;  %s18_s25 = sadd.s32 1, %s876_s25   ;;  %s1110_s30 = sld [smem:[#allocation8_spill]] }
 0x2e2   : > { %p15_p8 = scmp.ge.s32.totalorder %s18_s25, 6   ;;  %s1111_s18 = smov %s852_s19 }
 0x2e3   : > { %s1112_s19 = smov %s856_s20  ;;  %s1113_s20 = smov %s980_s9 }
 0x2e4   : > { %s1114_s21 = smov %s868_s23  ;;  %s1115_s22 = smov %s872_s24 }
 0x2e5   : > { %s1116_s23 = smov %s1119_s28  ;;  %17 = sbr.rel (!%p15_p8) target bundleno = 5 (0x5), region = 89 }
 0x2e7   : > { %s1117_s24 = smov %s1110_s30 }
 0x2ec   :  { %571 = vsyncpa [#allocation6], 1 }
 0x2ed   :  { %573 = vsyncpa [#allocation6 + $0x1], 1 }

// kernel: tpu_custom_call.1
= control target key start
LH: loop header
LB: loop body
LE: loop exit
PB: predicated region body
PF: predicated region fallthrough
CT: control target
= control target key end

     0   :  { %10 = vsyncpa [#allocation6], 0  ;;  %s1098_s0 = inlined_call_operand.vmem [shape: f32[32,8], index: 0, kind: input, shape index: {}]   ;;  %s1099_s1 = inlined_call_operand.vmem [shape: f32[32,32], index: 1, kind: input, shape index: {}]   ;;  %s1100_s2 = inlined_call_operand.vmem [shape: f32[32,8], index: 2, kind: input, shape index: {}]   ;;  %s1101_s3 = inlined_call_operand.vmem [shape: f32[32,8], index: 3, kind: input, shape index: {}]   ;;  %s1102_s4 = inlined_call_operand.vmem [shape: f32[1,8], index: 4, kind: input, shape index: {}]   ;;  %s1103_s5 = inlined_call_operand.hbm [shape: f32[2,8,128], index: 5, kind: output, shape index: {}]  }
   0x1   :  { %12 = vsyncpa [#allocation6 + $0x1], 0  ;;  %s913_s18 = smov 0   ;;  %s915_s19 = smov 0  }
   0x2   :  { %s917_s20 = smov 0   ;;  %s919_s21 = smov 0  }
   0x3   :  { %s921_s22 = smov 0   ;;  %s923_s23 = smov 0  }
   0x4   :  { %s925_s24 = smov 0   ;;  %s927_s25 = smov 0  }
   0x5 LB: > { %s647_s26 = sadd.s32 4294967295, %s876_s25   ;;  %s648_s27 = sadd.s32 4294967294, %s876_s25   ;;  %s876_s25 = sphi %s927_s25, %s18_s25   ;;  %s872_s24 = sphi %s925_s24, %s1117_s24   ;;  %s868_s23 = sphi %s923_s23, %s1116_s23   ;;  %s864_s22 = sphi %s921_s22, %s1115_s22   ;;  %s860_s21 = sphi %s919_s21, %s1114_s21   ;;  %s856_s20 = sphi %s917_s20, %s1113_s20   ;;  %s852_s19 = sphi %s915_s19, %s1112_s19   ;;  %s848_s18 = sphi %s913_s18, %s1111_s18  }
   0x6   : > { %s27_s28 = sadd.s32 1, %s868_s23  ;;  %s30_s29 = sadd.s32 1, %s872_s24 }
   0x7   : > { %p28_p0 = scmp.ge.s32.totalorder %s27_s28, 2  ;;  %p179_p1 = scmp.ne.s32.totalorder %s856_s20, %s852_s19 }
   0x8   : > { %p180_p2 = scmp.eq.s32.totalorder %s647_s26, 3  ;;  %p185_p4 = scmp.ne.s32.totalorder %s852_s19, %s848_s18 }
   0x9   : > { %s1119_s28 = smov (%p28_p0, %s27_s28), 0  ;;  %s1121_s29 = smov (!%p28_p0, %s30_s29), %s872_s24 }
   0xa   : > { %p962_p3 = por %p180_p2, %p179_p1  ;;  %p32_p5 = scmp.ge.s32.totalorder %s1121_s29, 2 }
   0xb   : > { %p186_p6 = scmp.eq.s32.totalorder %s648_s27, 3  ;;  %p657_p7 = scmp.ge.s32.totalorder %s876_s25, 1 }
   0xc   : > { %p243_p8 = scmp.lt.s32.totalorder %s876_s25, 5  ;;  %s1123_s29 = smov (%p32_p5, %s1121_s29), 0 }
   0xd   : > { %1107 = sst [smem:[#allocation8_spill]] %s1123_s29  ;;  %p972_p9 = por %p186_p6, %p185_p4 }
   0xe   : > { %p244_p10 = pnand %p657_p7, %p243_p8  ;;  %s166_s7 = ssub.s32 %s872_s24, %s1123_s29 }
   0xf   : > { %s169_s8 = sadd.s32 1, %s856_s20  ;;  %p167_p11 = scmp.eq.s32.totalorder %s166_s7, 0 }
  0x10   : > { %247 = sbr.rel (%p244_p10) target bundleno = 732 (0x2dc), region = 40  ;;  %s1104_s10 = sand.u32 (!%p244_p10), 1, %s852_s19  }
  0x11   : > { %s980_s9 = scalar_select %p167_p11, %s856_s20, %s169_s8  }
  0x12   : > { %s659_s11 = sshll.u32 (!%p244_p10), %s864_s22, 1  ;;  %s986_s12 = sshll.u32 (!%p244_p10), %s1104_s10, 3 }
  0x13   : > { %s285_s13 = sadd.s32 (!%p244_p10), %s860_s21, %s659_s11  ;;  %s283_s11 = scalar_lea.vmem (!%p244_p10), [#allocation5], %s986_s12 }
  0x14   : > { %p286_p12 = scmp.lt.s32.totalorder (!%p244_p10), %s285_s13, 3  ;;  %p665_p13 = scmp.ne.s32.totalorder (!%p244_p10), %s860_s21, 0 }
  0x17   : > { %s1125_s13 = smov (!%p286_p12, %s285_s13), 3  ;;  %311 = sbr.rel (%p665_p13) target bundleno = 30 (0x1e), region = 44 }
  0x18   : > { %s989_s14 = sshll.u32 %s1125_s13, 3  ;;  %vm312_vm0 = vcmask (!%p665_p13), 57344   ;;  %v878_v0 = vmov (!%p665_p13), 0.0  }
  0x19   : > { %s289_s17 = scalar_lea.vmem %s1098_s0, %s989_s14  ;;  %s297_s7 = scalar_lea.vmem %s1099_s1, %s989_s14  ;;  %313 = vst.msk [vmem:[#allocation2] sm:$0x1] (!%p665_p13), %vm312_vm0, %v878_v0  ;;  %314 = vst.msk [vmem:[#allocation3] sm:$0x1] (!%p665_p13), %vm312_vm0, %v878_v0 }
  0x1a   : > { %s305_s29 = scalar_lea.vmem %s1100_s2, %s989_s14  ;;  %315 = vst.msk [vmem:[#allocation4] sm:$0x1] (!%p665_p13), %vm312_vm0, %v878_v0 }
  0x1e PF: > { %v317_v1 = vld [vmem:[%s305_s29] sm:$0xff]  ;;  %vm324_vm1 = vcmask 64512   ;;  %v320_v6 = vld [vmem:[%s1101_s3 + $0x8] sm:$0xff]  ;;  %v321_v7 = vld [vmem:[%s1101_s3 + $0x10] sm:$0xff]  ;;  %v879_v8 = vmov 0.0|0.0   ;;  %vm880_vm2 = vmmov 0   ;;  %v339_v16 = vlaneseq }
  0x1f   : > { %v316_v2 = vld [vmem:[%s289_s17] sm:$0xff]  ;;  %v341_v3 = vsel %vm324_vm1, %v317_v1, -inf  ;;  %689 = vmatprep.subr.bf16.mxu0 %v879_v8  ;;  %v322_v10 = vld [vmem:[%s1101_s3 + $0x18] sm:$0xff]  ;;  %v881_v11 = vmov 0.0   ;;  %vm363_vm3 = vcmask 261120   ;;  %v336_v36 = vsub.f32 0.0, %v317_v1 }
  0x20   : > { %342 = vmax.xlane.f32.xlu0 %v341_v3  ;;  %v325_v4 = vsel %vm324_vm1, %v316_v2, -inf  ;;  %v319_v5 = vld [vmem:[%s1101_s3] sm:$0xff]  ;;  %686 = vmatprep.mubr.msk.f32.mxu0 %vm880_vm2, %v881_v11  ;;  %v693_v14 = vpack.c.bf16 %v322_v10, %v321_v7  ;;  %v1019_v17 = vand.u32 127, %v339_v16  ;;  %vm468_vm6 = vcmask 57344   ;;  %p668_p0 = scmp.ne.s32.totalorder %s860_s21, 1 }
  0x21   : > { %v690_v9 = vpack.c.bf16 %v320_v6, %v319_v5  ;;  %v318_v12 = vld [vmem:[%s297_s7] sm:$0xff] }
  0x22   : > { %v362_v13 = vmul.f32 %v318_v12, %v318_v12  ;;  %v459_v46 = vld [vmem:[#allocation2] sm:$0x1]  ;;  %vm531_vm10 = vcmp.eq.s32.totalorder (!%p668_p0), %v1019_v17, 2  ;;  %vm530_vm11 = vcmp.eq.s32.totalorder (!%p668_p0), %v1019_v17, 1  ;;  %vm529_vm12 = vcmp.eq.s32.totalorder (!%p668_p0), %v1019_v17, 0 }
  0x23   : > { %691 = vmatpush3.bf16.msra.mxu0 %v690_v9  ;;  %v667_v49 = vld [vmem:[%s1102_s4] ss:$0 sm:$0xff] }
  0x24   : > { %326 = vmax.xlane.f32.xlu0 %v325_v4  ;;  %692 = vmatprep.subr.bf16.mxu0 %v879_v8  ;;  %v364_v15 = vsel %vm363_vm3, %v362_v13, 0.0 }
  0x27   : > { %694 = vmatpush3.bf16.msra.mxu0 %v693_v14 }
  0x2a   : > { %687 = vmatmul.mubr.msk.f32.vlgmr.msra.gmra.mrb[0].mxu0 %vm363_vm3, %v318_v12 }
  0xad   : > { %v343_v18 = vpop.xlane.xlu0 %342 }
  0xae   : > { %vm344_vm4 = vcmp.eq.f32.partialorder %v317_v1, %v343_v18  ;;  %v470_v18 = vld [vmem:[#allocation3] sm:$0x1] }
  0xaf   : > { %v345_v19 = vsel %vm344_vm4, %v1019_v17, 8 }
  0xb0   : > { %v346_v20 = vsel %vm324_vm1, %v345_v19, 2147483647  ;;  %v481_v19 = vld [vmem:[#allocation4] sm:$0x1] }
  0xb1   : > { %v327_v21 = vpop.xlane.xlu0 %326  ;;  %v348_v22 = vshra.s32 %v346_v20, 16  ;;  %v347_v30 = vand.u32 65535, %v346_v20 }
  0xb2   : > { %v328_v23 = vsub.f32 %v316_v2, %v327_v21 }
  0xb3   : > { %v350_v24 = vcvt.s32.f32 %v348_v22  ;;  %v349_v32 = vcvt.s32.f32 %v347_v30 }
  0xb4   : > { %v329_v25 = vmul.f32 1.442695, %v328_v23 }
  0xb5   : > { %351 = vmin.xlane.f32.xlu1 %v350_v24 }
  0xb6   : > { %776 = vpow2.f32 %v329_v25 }
  0xb9   : > { %365 = vadd.xlane.f32.xlu1 %v364_v15 }
  0xc0   : > { %v777_v26 = vpop.eup %776 }
  0xc1   : > { %v331_v27 = vsel %vm324_vm1, %v777_v26, 0.0 }
  0xc2   : > { %332 = vadd.xlane.f32.xlu0 %v331_v27 }
  0xfd   : > { %v436_v28 = vpop.f32.mrb[0].mxu0 }
  0xfe   : > { %v688_v29 = vpop.f32.mrb[1].mxu0  ;;  %v447_v51 = vmul.f32 2.0, %v436_v28 }
 0x142   : > { %v352_v31 = vpop.xlane.xlu1 %351 }
 0x143   : > { %vm353_vm5 = vcmp.eq.f32.partialorder %v350_v24, %v352_v31  ;;  %v358_v59 = vcvt.f32.s32 %v352_v31 }
 0x144   : > { %v354_v33 = vsel %vm353_vm5, %v349_v32, inf }
 0x145   : > { %355 = vmin.xlane.f32.xlu1 %v354_v33  ;;  %v359_v63 = vshll.u32 %v358_v59, 16 }
 0x146   : > { %v366_v50 = vpop.xlane.xlu1 %365 }
 0x147   : > { %v446_v52 = vadd.f32 %v667_v49, %v366_v50 }
 0x149   : > { %v448_v53 = vsub.f32 %v446_v52, %v447_v51 }
 0x14b   : > { %v449_v54 = vmax.f32 %v448_v53, 0.0 }
 0x14d   : > { %vm452_vm7 = vcmp.eq.f32.partialorder %v449_v54, inf  ;;  %v455_v57 = vand.u32 2147483648, %v449_v54  ;;  %vm454_vm8 = vcmp.eq.f32.partialorder %v449_v54, 0.0 }
 0x14f   : > { %v333_v34 = vpop.xlane.xlu0 %332 }
 0x150   : > { %778 = vlog2.f32 %v333_v34 }
 0x151   : > { %780 = vrsqrt.f32 %v449_v54 }
 0x15a   : > { %v779_v35 = vpop.eup %778 }
 0x15b   : > { %v335_v37 = vmul.f32 0.6931472, %v779_v35  ;;  %v781_v55 = vpop.eup %780 }
 0x15c   : > { %v451_v56 = vmul.f32 %v781_v55, %v449_v54 }
 0x15d   : > { %v337_v38 = vsub.f32 %v328_v23, %v335_v37 }
 0x15e   : > { %v453_v58 = vsel %vm452_vm7, %v449_v54, %v451_v56 }
 0x15f   : > { %v338_v39 = vmul.f32 %v337_v38, %v336_v36  ;;  %v456_v60 = vsel %vm454_vm8, %v455_v57, %v453_v58 }
 0x160   : > { %v457_v61 = vsub.f32 10.0, %v456_v60 }
 0x161   : > { %v460_v40 = vsel %vm324_vm1, %v338_v39, 0.0 }
 0x162   : > { %v461_v41 = vrot.slane %v460_v40, 4  ;;  %v458_v2 = vmax.f32 %v457_v61, 0.0 }
 0x164   : > { %v462_v42 = vadd.f32 %v461_v41, %v460_v40 }
 0x166   : > { %v463_v43 = vrot.slane %v462_v42, 2 }
 0x168   : > { %v464_v44 = vadd.f32 %v463_v43, %v462_v42 }
 0x16a   : > { %v465_v45 = vrot.slane %v464_v44, 1 }
 0x16c   : > { %v466_v47 = vadd.f32 %v465_v45, %v464_v44 }
 0x16e   : > { %v467_v48 = vadd.f32 %v466_v47, %v459_v46 }
 0x170   : > { %469 = vst.msk [vmem:[#allocation2] sm:$0x1] %vm468_vm6, %v467_v48 }
 0x177   : > { %v496_v25 = vld [vmem:[#allocation2] sm:$0x1] (!%p668_p0) }
 0x178   : > { %v497_v28 = vsel (!%p668_p0), %vm468_vm6, %v496_v25, 0.0 }
 0x179   : > { %498 = vadd.xlane.f32.xlu0 (!%p668_p0), %v497_v28 }
 0x1d2   : > { %v356_v62 = vpop.xlane.xlu1 %355 }
 0x1d3   : > { %v357_v0 = vcvt.f32.s32 %v356_v62 }
 0x1d5   : > { %v360_v1 = vadd.s32 %v359_v63, %v357_v0 }
 0x1d7   : > { %vm361_vm9 = vcmp.eq.s32.totalorder %v1019_v17, %v360_v1 }
 0x1d8   : > { %v471_v3 = vsel %vm361_vm9, %v449_v54, 0.0  ;;  %v482_v4 = vsel %vm361_vm9, 10.0, %v458_v2 }
 0x1d9   : > { %v472_v5 = vsel %vm324_vm1, %v471_v3, 0.0  ;;  %v483_v6 = vsel %vm324_vm1, %v482_v4, 0.0 }
 0x1da   : > { %v473_v7 = vrot.slane %v472_v5, 4  ;;  %v484_v8 = vrot.slane %v483_v6, 4 }
 0x1dc   : > { %v474_v9 = vadd.f32 %v473_v7, %v472_v5  ;;  %v485_v10 = vadd.f32 %v484_v8, %v483_v6 }
 0x1de   : > { %v475_v11 = vrot.slane %v474_v9, 2  ;;  %v486_v12 = vrot.slane %v485_v10, 2 }
 0x1e0   : > { %v476_v13 = vadd.f32 %v475_v11, %v474_v9  ;;  %v487_v14 = vadd.f32 %v486_v12, %v485_v10 }
 0x1e2   : > { %v477_v15 = vrot.slane %v476_v13, 1  ;;  %v488_v16 = vrot.slane %v487_v14, 1  ;;  %495 = sbr.rel (%p668_p0) target bundleno = 707 (0x2c3), region = 48 }
 0x1e4   : > { %v478_v20 = vadd.f32 %v477_v15, %v476_v13  ;;  %v489_v21 = vadd.f32 %v488_v16, %v487_v14 }
 0x1e6   : > { %v479_v22 = vadd.f32 %v478_v20, %v470_v18  ;;  %v490_v23 = vadd.f32 %v489_v21, %v481_v19 }
 0x1e8   : > { %480 = vst.msk [vmem:[#allocation3] sm:$0x1] %vm468_vm6, %v479_v22  ;;  %491 = vst.msk [vmem:[#allocation4] sm:$0x1] %vm468_vm6, %v490_v23 }
 0x1ef   : > { %v518_v24 = vld [vmem:[#allocation4] sm:$0x1]  ;;  %v507_v26 = vld [vmem:[#allocation3] sm:$0x1] }
 0x1f0   : > { %v519_v27 = vsel %vm468_vm6, %v518_v24, 0.0  ;;  %v508_v29 = vsel %vm468_vm6, %v507_v26, 0.0 }
 0x1f1   : > { %520 = vadd.xlane.f32.xlu1 %v519_v27  ;;  %509 = vadd.xlane.f32.xlu0 %v508_v29 }
 0x206   : > { %v499_v31 = vpop.xlane.xlu0 %498 }
 0x207   : > { %v500_v33 = vrot.slane %v499_v31, 4 }
 0x209   : > { %v501_v35 = vadd.f32 %v500_v33, %v499_v31 }
 0x20b   : > { %v502_v38 = vrot.slane %v501_v35, 2 }
 0x20d   : > { %v503_v41 = vadd.f32 %v502_v38, %v501_v35 }
 0x20f   : > { %v504_v44 = vrot.slane %v503_v41, 1 }
 0x211   : > { %v505_v46 = vadd.f32 %v504_v44, %v503_v41 }
 0x213   : > { %695 = vpush %v505_v46 }
 0x244   : > { %s696_s21 = spop %695 }
 0x245   : > { %v536_v54 = vstv %s696_s21 }
 0x27e   : > { %v521_v30 = vpop.xlane.xlu1 %520  ;;  %v510_v36 = vpop.xlane.xlu0 %509 }
 0x27f   : > { %v522_v32 = vrot.slane %v521_v30, 4  ;;  %v511_v39 = vrot.slane %v510_v36, 4 }
 0x281   : > { %v523_v34 = vadd.f32 %v522_v32, %v521_v30  ;;  %v512_v40 = vadd.f32 %v511_v39, %v510_v36 }
 0x283   : > { %v524_v37 = vrot.slane %v523_v34, 2  ;;  %v513_v43 = vrot.slane %v512_v40, 2 }
 0x285   : > { %v525_v42 = vadd.f32 %v524_v37, %v523_v34  ;;  %v514_v45 = vadd.f32 %v513_v43, %v512_v40 }
 0x287   : > { %v526_v47 = vrot.slane %v525_v42, 1  ;;  %v515_v48 = vrot.slane %v514_v45, 1 }
 0x289   : > { %v516_v49 = vadd.f32 %v515_v48, %v514_v45  ;;  %v527_v50 = vadd.f32 %v526_v47, %v525_v42 }
 0x28b   : > { %697 = vpush %v516_v49 }
 0x28c   : > { %699 = vpush %v527_v50 }
 0x2bc   : > { %s698_s8 = spop %697 }
 0x2bd   : > { %v534_v51 = vstv %s698_s8  ;;  %s700_s10 = spop %699 }
 0x2be   : > { %v532_v52 = vstv %s700_s10 }
 0x2bf   : > { %v533_v53 = vsel %vm531_vm10, %v532_v52, 0.0 }
 0x2c0   : > { %v535_v55 = vsel %vm530_vm11, %v534_v51, %v533_v53 }
 0x2c1   : > { %v537_v56 = vsel %vm529_vm12, %v536_v54, %v535_v55 }
 0x2c2   : > { %538 = vst [vmem:[%s283_s11] sm:$0xff] %v537_v56 }
 0x2c3 PF: > { %s670_s13 = sshll.u32 %s864_s22, 7  ;;  %s553_s26 = sshll.u32 %s283_s11, 4  ;;  %s554_s26 = int_to_ptr.vmem [resolvable:$true] %s553_s26 }
 0x2c4   : > { %s1047_s16 = scalar_lea.hbm %s1103_s5, %s670_s13  ;;  %s1109_s29 = sand.u32 1, %s852_s19  }
 0x2c5   : > { %s540_s17 = scalar_lea.sflag [#allocation6], %s1109_s29  ;;  %s782_s27 = scalar_lea.vmem %s554_s26, 128 }
 0x2c6   : > { %p783_p1 = scmp.ne.s32.totalorder %s554_s26, %s782_s27  ;;  %s882_s7 = smov [#allocation5]  }
 0x2c7   : > { %s786_s21 = sshll.u32 %s882_s7, 4  ;;  %s787_s21 = int_to_ptr.vmem [resolvable:$false] %s786_s21 }
 0x2c8   : > { %p784_p2 = pnand %p783_p1, %p962_p3  ;;  %s788_s8 = scalar_lea.vmem %s787_s21, 256 }
 0x2c9   : > { %p789_p5 = scmp.lt.s32.totalorder %s554_s26, %s787_s21  ;;  %p790_p6 = scmp.lt.s32.totalorder %s788_s8, %s782_s27 }
 0x2ca   : > { %p785_p4 = pneg %p784_p2 }
 0x2cb   : > { %p791_p7 = por %p790_p6, %p789_p5 }
 0x2cd   : > { %p792_p8 = pnand %p791_p7, %p785_p4 }
 0x2cf   : > { %795 = shalt.err (!%p792_p8)
}
 0x2d0   : > { %s796_s22 = scalar_lea.hbm %s1047_s16, 128  ;;  %s800_s10 = scalar_lea.hbm %s1103_s5, 256 }
 0x2d1   : > { %p797_p10 = scmp.ne.s32.totalorder %s1047_s16, %s796_s22  ;;  %p801_p13 = scmp.lt.u32.totalorder %s1047_s16, %s1103_s5 }
 0x2d2   : > { %p802_p0 = scmp.lt.u32.totalorder %s800_s10, %s796_s22  ;;  %p804_p2 = scmp.lt.u32.totalorder %s796_s22, %s1047_s16 }
 0x2d3   : > { %p798_p11 = pnand %p797_p10, %p962_p3 }
 0x2d4   : > { %p803_p1 = por %p802_p0, %p801_p13 }
 0x2d5   : > { %p799_p12 = pneg %p798_p11 }
 0x2d6   : > { %p805_p4 = por %p804_p2, %p803_p1 }
 0x2d8   : > { %p806_p5 = pnand %p805_p4, %p799_p12 }
 0x2da   : > { %809 = shalt.err (!%p806_p5)
}
 0x2db   : > { %701 = dma.vmem_to_hbm [thread:$0]  (%p962_p3), %s554_s26, 128, %s1047_s16, %s540_s17  }
 0x2dc PF: > { %p707_p6 = scmp.ge.s32.totalorder %s876_s25, 2  ;;  %s565_s15 = sand.u32 1, %s848_s18  }
 0x2dd   : > { %s566_s29 = scalar_lea.sflag [#allocation6], %s565_s15 }
 0x2de   : > { %p704_p7 = pnand %p707_p6, %p972_p9 }
 0x2e0   : > { %843 = dma.done.wait (!%p704_p7), %s566_s29, 128  }
 0x2e1   : > { %845 = vsyncadd (!%p704_p7), %s566_s29, 4294967168  ;;  %s18_s25 = sadd.s32 1, %s876_s25   ;;  %s1110_s30 = sld [smem:[#allocation8_spill]] }
 0x2e2   : > { %p15_p8 = scmp.ge.s32.totalorder %s18_s25, 6   ;;  %s1111_s18 = smov %s852_s19 }
 0x2e3   : > { %s1112_s19 = smov %s856_s20  ;;  %s1113_s20 = smov %s980_s9 }
 0x2e4   : > { %s1114_s21 = smov %s868_s23  ;;  %s1115_s22 = smov %s872_s24 }
 0x2e5   : > { %s1116_s23 = smov %s1119_s28  ;;  %17 = sbr.rel (!%p15_p8) target bundleno = 5 (0x5), region = 89 }
 0x2e7   : > { %s1117_s24 = smov %s1110_s30 }
 0x2ec   :  { %571 = vsyncpa [#allocation6], 1 }
 0x2ed   :  { %573 = vsyncpa [#allocation6 + $0x1], 1 }

</bundles_post_ra>
